<compile_context>
chip_gen: v5e
topology: v5e:2x2
jax: 0.10.0
libtpu: 0.0.40
codegen_flags: <defaults>
</compile_context>

<pallas_src>
import functools

import jax
import jax.numpy as jnp
from jax import lax
from jax.experimental import pallas as pl
from jax.experimental.pallas import tpu as pltpu


def _round_up(n, m):
    return ((n + m - 1) // m) * m


# --------------------- Pass 1: conv + bias + BN partial moments --------------
def _conv_bias_stats_kernel(p_ref, w_ref, b_ref, conv_ref, stats_ref, *, tm):
    """One grid step: a block of `bm` output rows.

    p_ref     : (KKCp, bm)   im2col patches, M lane-dense (bf16 or f32)
    w_ref     : (KKCp, Cp)   conv weight, Cout zero-padded to Cp (mult of 128)
    b_ref     : (1, Cp) f32  conv bias (zeros in padded lanes)
    conv_ref  : (bm, Cp)     conv + bias for this block (bf16 or f32)
    stats_ref : (1, 8, Cp) f32  row 0 = sum(dot), row 1 = sum(dot^2) over rows
    """
    bm, cp = conv_ref.shape
    num_sub = bm // tm

    w = w_ref[...]
    # Hoisted broadcast (JAX does not CSE broadcast_in_dim inside loops).
    b_tile = jnp.broadcast_to(b_ref[...], (tm, cp))

    def body(i, carry):
        s, ss = carry
        off = pl.multiple_of(i * tm, tm)
        # (tm, Cp): contract the KKCp sublane axis of the patches with weights.
        dot = lax.dot_general(
            p_ref[:, pl.ds(off, tm)], w,
            dimension_numbers=(((0,), (0,)), ((), ())),
            preferred_element_type=jnp.float32)
        conv_ref[pl.ds(off, tm), :] = (dot + b_tile).astype(conv_ref.dtype)
        s = s + jnp.sum(dot, axis=0, keepdims=True)          # pre-bias moments
        ss = ss + jnp.sum(dot * dot, axis=0, keepdims=True)
        return s, ss

    init = (jnp.zeros((1, cp), jnp.float32), jnp.zeros((1, cp), jnp.float32))
    s, ss = lax.fori_loop(0, num_sub, body, init, unroll=True)
    stats_ref[0] = jnp.concatenate(
        [s, ss, jnp.zeros((6, cp), jnp.float32)], axis=0)


# --------------------- Pass 2: y = conv * scale + shift ----------------------
def _bn_apply_kernel(conv_ref, scale_ref, shift_ref, o_ref, *, tm):
    bm, cp = o_ref.shape
    scale = jnp.broadcast_to(scale_ref[...], (tm, cp))       # hoisted
    shift = jnp.broadcast_to(shift_ref[...], (tm, cp))

    def body(i, carry):
        off = pl.multiple_of(i * tm, tm)
        x = conv_ref[pl.ds(off, tm), :].astype(jnp.float32)
        o_ref[pl.ds(off, tm), :] = (x * scale + shift).astype(o_ref.dtype)
        return carry

    lax.fori_loop(0, bm // tm, body, 0, unroll=True)


def conv2d_bn(x_nchw, weight_hwio, bias, gamma, beta, *, stride=1, eps=1e-5,
              mxu_dtype=jnp.bfloat16, out_dtype=jnp.float32, block_m=512):
    """Conv2dBN forward: (N, Cin, H, W) -> (N, Cout, Ho, Wo).

    mxu_dtype: matmul-operand + intermediate-conv-storage dtype (bf16 default
               for v6e/v7x peak; jnp.float32 for bit-accurate verification).
    out_dtype: final output dtype (f32 matches PyTorch; bf16 halves writeback).
    Accumulation and all BN statistics math is always f32.
    """
    N, Cin, H, W = x_nchw.shape
    K, K2, Cin_w, Cout = weight_hwio.shape
    assert K == K2 and Cin_w == Cin
    pad = (K - 1) // 2                     # same padding rule as the module
    Ho = (H + 2 * pad - K) // stride + 1
    Wo = (W + 2 * pad - K) // stride + 1
    M = N * Ho * Wo
    KKC = K * K * Cin
    KKCp = _round_up(KKC, 16)              # sublane-aligned contraction depth
    Cp = _round_up(Cout, 128)              # lane-dense channel axis

    tm = 128                               # inner sub-tile rows (vreg bound)
    block_m = _round_up(max(tm, min(block_m, _round_up(M, tm))), tm)
    Mp = _round_up(M, block_m)             # padded rows are all-zero patches
    num_tiles = Mp // block_m
    conv_dtype = mxu_dtype                 # intermediate conv+bias storage

    # ----------------- Glue (plain XLA): pad + transposed im2col ------------
    # Row order of patches_t matches weight_hwio.reshape(KKC, Cout):
    # row = kh*K*Cin + kw*Cin + cin ; column = n*Ho*Wo + ho*Wo + wo.
    x_pad = jnp.pad(x_nchw, ((0, 0), (0, 0), (pad, pad), (pad, pad)))
    taps = []
    for kh in range(K):
        for kw in range(K):
            t = lax.slice(
                x_pad,
                (0, 0, kh, kw),
                (N, Cin, kh + (Ho - 1) * stride + 1,
                 kw + (Wo - 1) * stride + 1),
                (1, 1, stride, stride))                     # (N, Cin, Ho, Wo)
            taps.append(jnp.transpose(t, (1, 0, 2, 3)).reshape(Cin, M))
    patches_t = jnp.concatenate(taps, axis=0)               # (KKC, M)
    patches_t = jnp.pad(patches_t, ((0, KKCp - KKC), (0, Mp - M)))
    patches_t = patches_t.astype(mxu_dtype)                 # (KKCp, Mp)

    w2 = jnp.pad(weight_hwio.reshape(KKC, Cout),
                 ((0, KKCp - KKC), (0, Cp - Cout))).astype(mxu_dtype)
    bias_p = jnp.pad(bias.astype(jnp.float32), (0, Cp - Cout))
    gamma_p = jnp.pad(gamma.astype(jnp.float32), (0, Cp - Cout))
    beta_p = jnp.pad(beta.astype(jnp.float32), (0, Cp - Cout))
    b2 = bias_p.reshape(1, Cp)

    cparams = pltpu.CompilerParams(
        dimension_semantics=("parallel",),
        vmem_limit_bytes=32 * 1024 * 1024)

    # ----------------- Pass 1: conv + bias + per-tile BN partial sums -------
    conv_flat, stats = pl.pallas_call(
        functools.partial(_conv_bias_stats_kernel, tm=tm),
        grid=(num_tiles,),
        in_specs=[
            pl.BlockSpec((KKCp, block_m), lambda i: (0, i)),   # patches
            pl.BlockSpec((KKCp, Cp), lambda i: (0, 0)),        # weights
            pl.BlockSpec((1, Cp), lambda i: (0, 0)),           # bias
        ],
        out_specs=[
            pl.BlockSpec((block_m, Cp), lambda i: (i, 0)),     # conv + bias
            pl.BlockSpec((1, 8, Cp), lambda i: (i, 0, 0)),     # partial sums
        ],
        out_shape=[
            jax.ShapeDtypeStruct((Mp, Cp), conv_dtype),
            jax.ShapeDtypeStruct((num_tiles, 8, Cp), jnp.float32),
        ],
        compiler_params=cparams,
    )(patches_t, w2, b2)

    # ----------------- Tiny stat combine (plain XLA) ------------------------
    # Padded rows have all-zero patches -> dot == 0 -> contribute nothing, so
    # no correction term is needed; divide by the true M.
    sum_dot = jnp.sum(stats[:, 0, :], axis=0)                 # (Cp,)
    sumsq_dot = jnp.sum(stats[:, 1, :], axis=0)
    inv_m = jnp.float32(1.0 / M)
    mean_dot = sum_dot * inv_m
    var = jnp.maximum(sumsq_dot * inv_m - mean_dot * mean_dot, 0.0)  # biased
    inv_std = lax.rsqrt(var + jnp.float32(eps))
    scale = gamma_p * inv_std                                 # (Cp,)
    shift = beta_p - (mean_dot + bias_p) * scale
    # TODO(synk): expose (mean_dot + bias_p) and var*M/(M-1) if the caller needs
    # BatchNorm2d running_mean/running_var momentum updates (eval parity).

    # ----------------- Pass 2: normalize (in place when dtypes match) -------
    aliases = ({0: 0} if jnp.dtype(conv_dtype) == jnp.dtype(out_dtype) else {})
    out2d = pl.pallas_call(
        functools.partial(_bn_apply_kernel, tm=tm),
        grid=(num_tiles,),
        in_specs=[
            pl.BlockSpec((block_m, Cp), lambda i: (i, 0)),     # conv + bias
            pl.BlockSpec((1, Cp), lambda i: (0, 0)),           # scale
            pl.BlockSpec((1, Cp), lambda i: (0, 0)),           # shift
        ],
        out_specs=pl.BlockSpec((block_m, Cp), lambda i: (i, 0)),
        out_shape=jax.ShapeDtypeStruct((Mp, Cp), out_dtype),
        compiler_params=cparams,
        input_output_aliases=aliases,
    )(conv_flat, scale.reshape(1, Cp), shift.reshape(1, Cp))

    # Glue: drop row/channel padding, back to NCHW.
    out = out2d[:M, :Cout].reshape(N, Ho, Wo, Cout)
    return jnp.transpose(out, (0, 3, 1, 2))


def _reference(x_nchw, weight_hwio, bias, gamma, beta, *, stride=1, eps=1e-5):
    """Pure-JAX reference mirroring PyTorch Conv2d + train-mode BatchNorm2d."""
    K = weight_hwio.shape[0]
    pad = (K - 1) // 2
    w_oihw = jnp.transpose(weight_hwio, (3, 2, 0, 1))
    y = lax.conv_general_dilated(
        x_nchw.astype(jnp.float32), w_oihw.astype(jnp.float32),
        window_strides=(stride, stride), padding=[(pad, pad), (pad, pad)],
        dimension_numbers=("NCHW", "OIHW", "NCHW"))
    y = y + bias.reshape(1, -1, 1, 1)
    mean = jnp.mean(y, axis=(0, 2, 3), keepdims=True)
    var = jnp.mean((y - mean) ** 2, axis=(0, 2, 3), keepdims=True)  # biased
    y = (y - mean) * lax.rsqrt(var + eps)
    return y * gamma.reshape(1, -1, 1, 1) + beta.reshape(1, -1, 1, 1)


if __name__ == "__main__":
    # Shapes consistent with Conv2dBN(nIn=4, nOut=8, kSize=3).
    N, Cin, H, W = 2, 4, 16, 16
    Cout, K = 8, 3

    key = jax.random.PRNGKey(0)
    kx, kw, kb = jax.random.split(key, 3)
    x = jax.random.normal(kx, (N, Cin, H, W), dtype=jnp.float32)

    fan_in = Cin * K * K
    bound = 1.0 / (fan_in ** 0.5)
    weight_hwio = jax.random.uniform(
        kw, (K, K, Cin, Cout), minval=-bound, maxval=bound, dtype=jnp.float32)
    bias = jax.random.uniform(kb, (Cout,), minval=-bound, maxval=bound,
                              dtype=jnp.float32)
    gamma = jnp.ones((Cout,), jnp.float32)    # BatchNorm2d weight init
    beta = jnp.zeros((Cout,), jnp.float32)    # BatchNorm2d bias init

    for stride in (1, 2):
        ref = _reference(x, weight_hwio, bias, gamma, beta, stride=stride)

        # f32-operand path: tight check of the fused kernel math.
        out_f32 = conv2d_bn(x, weight_hwio, bias, gamma, beta, stride=stride,
                            mxu_dtype=jnp.float32, out_dtype=jnp.float32)
        out_f32 = jax.block_until_ready(out_f32)
        assert out_f32.shape == ref.shape
        assert jnp.allclose(out_f32, ref, atol=1e-4, rtol=1e-4), \
            f"f32 mismatch (stride={stride})"

        # Default bf16-MXU / bf16-intermediate path (looser tolerance).
        out_def = conv2d_bn(x, weight_hwio, bias, gamma, beta, stride=stride)
        out_def = jax.block_until_ready(out_def)
        assert out_def.shape == ref.shape
        assert jnp.allclose(out_def.astype(jnp.float32), ref,
                            atol=5e-2, rtol=5e-2), \
            f"bf16 mismatch (stride={stride})"

    print("KERNEL_OK")
</pallas_src>

<mosaic_0001>
module attributes {stable_mosaic.version = 11 : i64} {
  func.func @_conv_bias_stats_kernel(%arg0: i32, %arg1: memref<48x512xf32, #tpu.memory_space<vmem>>, %arg2: memref<48x128xf32, #tpu.memory_space<vmem>>, %arg3: memref<1x128xf32, #tpu.memory_space<vmem>>, %arg4: memref<512x128xf32, #tpu.memory_space<vmem>>, %arg5: memref<1x8x128xf32, #tpu.memory_space<vmem>>) attributes {dimension_semantics = [#tpu.dimension_semantics<parallel>], iteration_bounds = array<i64: 1>, scalar_prefetch = 0 : i64, scratch_operands = 0 : i64, tpu.core_type = #tpu.core_type<tc>, window_params = [{transform_indices = @transform_0, window_bounds = array<i64: 48, 512>}, {pipeline_mode = #tpu.pipeline_mode<synchronous>, transform_indices = @transform_1, window_bounds = array<i64: 48, 128>}, {pipeline_mode = #tpu.pipeline_mode<synchronous>, transform_indices = @transform_2, window_bounds = array<i64: 1, 128>}, {transform_indices = @transform_3, window_bounds = array<i64: 512, 128>}, {transform_indices = @transform_4, window_bounds = array<i64: 1, 8, 128>}]} {
    %c0 = arith.constant 0 : index
    %c0_0 = arith.constant 0 : index
    %0 = vector.load %arg2[%c0, %c0_0] : memref<48x128xf32, #tpu.memory_space<vmem>>, vector<48x128xf32>
    %c0_1 = arith.constant 0 : index
    %c0_2 = arith.constant 0 : index
    %1 = vector.load %arg3[%c0_1, %c0_2] : memref<1x128xf32, #tpu.memory_space<vmem>>, vector<1x128xf32>
    %2 = vector.shape_cast %1 : vector<1x128xf32> to vector<1x128xf32>
    %3 = vector.broadcast %2 : vector<1x128xf32> to vector<128x128xf32>
    %cst = arith.constant 0.000000e+00 : f32
    %4 = vector.broadcast %cst : f32 to vector<1x128xf32>
    %cst_3 = arith.constant 0.000000e+00 : f32
    %5 = vector.broadcast %cst_3 : f32 to vector<1x128xf32>
    %c0_i32 = arith.constant 0 : i32
    %c128_i32 = arith.constant 128 : i32
    %6 = arith.muli %c0_i32, %c128_i32 : i32
    %7 = tpu.assume_multiple %6, 128 : i32
    %c0_4 = arith.constant 0 : index
    %8 = arith.index_cast %7 : i32 to index
    %9 = vector.load %arg1[%c0_4, %8] : memref<48x512xf32, #tpu.memory_space<vmem>>, vector<48x128xf32>
    %cst_5 = arith.constant dense<0.000000e+00> : vector<128x128xf32>
    %10 = tpu.matmul %9, %0, %cst_5 {dimension_numbers = #tpu.dot_dimension_numbers<[0], [0], [1], [1], [0, 1, 1, 1], [], []>} : vector<48x128xf32>, vector<48x128xf32>, vector<128x128xf32> -> vector<128x128xf32>
    %11 = arith.addf %10, %3 : vector<128x128xf32>
    %12 = arith.index_cast %7 : i32 to index
    %c0_6 = arith.constant 0 : index
    %13 = vector.load %arg4[%12, %c0_6] : memref<512x128xf32, #tpu.memory_space<vmem>>, vector<128x128xf32>
    tpu.vector_store %arg4[%12, %c0_6], %11 {strides = array<i32>} : memref<512x128xf32, #tpu.memory_space<vmem>>, vector<128x128xf32>,
    %cst_7 = arith.constant dense<0.000000e+00> : vector<128xf32>
    %14 = vector.multi_reduction <add>, %10, %cst_7 [0] : vector<128x128xf32> to vector<128xf32>
    %15 = vector.shape_cast %14 : vector<128xf32> to vector<1x128xf32>
    %16 = arith.addf %4, %15 : vector<1x128xf32>
    %17 = arith.mulf %10, %10 : vector<128x128xf32>
    %cst_8 = arith.constant dense<0.000000e+00> : vector<128xf32>
    %18 = vector.multi_reduction <add>, %17, %cst_8 [0] : vector<128x128xf32> to vector<128xf32>
    %19 = vector.shape_cast %18 : vector<128xf32> to vector<1x128xf32>
    %20 = arith.addf %5, %19 : vector<1x128xf32>
    %c1_i32 = arith.constant 1 : i32
    %c128_i32_9 = arith.constant 128 : i32
    %21 = arith.muli %c1_i32, %c128_i32_9 : i32
    %22 = tpu.assume_multiple %21, 128 : i32
    %c0_10 = arith.constant 0 : index
    %23 = arith.index_cast %22 : i32 to index
    %24 = vector.load %arg1[%c0_10, %23] : memref<48x512xf32, #tpu.memory_space<vmem>>, vector<48x128xf32>
    %cst_11 = arith.constant dense<0.000000e+00> : vector<128x128xf32>
    %25 = tpu.matmul %24, %0, %cst_11 {dimension_numbers = #tpu.dot_dimension_numbers<[0], [0], [1], [1], [0, 1, 1, 1], [], []>} : vector<48x128xf32>, vector<48x128xf32>, vector<128x128xf32> -> vector<128x128xf32>
    %26 = arith.addf %25, %3 : vector<128x128xf32>
    %27 = arith.index_cast %22 : i32 to index
    %c0_12 = arith.constant 0 : index
    %28 = vector.load %arg4[%27, %c0_12] : memref<512x128xf32, #tpu.memory_space<vmem>>, vector<128x128xf32>
    tpu.vector_store %arg4[%27, %c0_12], %26 {strides = array<i32>} : memref<512x128xf32, #tpu.memory_space<vmem>>, vector<128x128xf32>,
    %cst_13 = arith.constant dense<0.000000e+00> : vector<128xf32>
    %29 = vector.multi_reduction <add>, %25, %cst_13 [0] : vector<128x128xf32> to vector<128xf32>
    %30 = vector.shape_cast %29 : vector<128xf32> to vector<1x128xf32>
    %31 = arith.addf %16, %30 : vector<1x128xf32>
    %32 = arith.mulf %25, %25 : vector<128x128xf32>
    %cst_14 = arith.constant dense<0.000000e+00> : vector<128xf32>
    %33 = vector.multi_reduction <add>, %32, %cst_14 [0] : vector<128x128xf32> to vector<128xf32>
    %34 = vector.shape_cast %33 : vector<128xf32> to vector<1x128xf32>
    %35 = arith.addf %20, %34 : vector<1x128xf32>
    %c2_i32 = arith.constant 2 : i32
    %c128_i32_15 = arith.constant 128 : i32
    %36 = arith.muli %c2_i32, %c128_i32_15 : i32
    %37 = tpu.assume_multiple %36, 128 : i32
    %c0_16 = arith.constant 0 : index
    %38 = arith.index_cast %37 : i32 to index
    %39 = vector.load %arg1[%c0_16, %38] : memref<48x512xf32, #tpu.memory_space<vmem>>, vector<48x128xf32>
    %cst_17 = arith.constant dense<0.000000e+00> : vector<128x128xf32>
    %40 = tpu.matmul %39, %0, %cst_17 {dimension_numbers = #tpu.dot_dimension_numbers<[0], [0], [1], [1], [0, 1, 1, 1], [], []>} : vector<48x128xf32>, vector<48x128xf32>, vector<128x128xf32> -> vector<128x128xf32>
    %41 = arith.addf %40, %3 : vector<128x128xf32>
    %42 = arith.index_cast %37 : i32 to index
    %c0_18 = arith.constant 0 : index
    %43 = vector.load %arg4[%42, %c0_18] : memref<512x128xf32, #tpu.memory_space<vmem>>, vector<128x128xf32>
    tpu.vector_store %arg4[%42, %c0_18], %41 {strides = array<i32>} : memref<512x128xf32, #tpu.memory_space<vmem>>, vector<128x128xf32>,
    %cst_19 = arith.constant dense<0.000000e+00> : vector<128xf32>
    %44 = vector.multi_reduction <add>, %40, %cst_19 [0] : vector<128x128xf32> to vector<128xf32>
    %45 = vector.shape_cast %44 : vector<128xf32> to vector<1x128xf32>
    %46 = arith.addf %31, %45 : vector<1x128xf32>
    %47 = arith.mulf %40, %40 : vector<128x128xf32>
    %cst_20 = arith.constant dense<0.000000e+00> : vector<128xf32>
    %48 = vector.multi_reduction <add>, %47, %cst_20 [0] : vector<128x128xf32> to vector<128xf32>
    %49 = vector.shape_cast %48 : vector<128xf32> to vector<1x128xf32>
    %50 = arith.addf %35, %49 : vector<1x128xf32>
    %c3_i32 = arith.constant 3 : i32
    %c128_i32_21 = arith.constant 128 : i32
    %51 = arith.muli %c3_i32, %c128_i32_21 : i32
    %52 = tpu.assume_multiple %51, 128 : i32
    %c0_22 = arith.constant 0 : index
    %53 = arith.index_cast %52 : i32 to index
    %54 = vector.load %arg1[%c0_22, %53] : memref<48x512xf32, #tpu.memory_space<vmem>>, vector<48x128xf32>
    %cst_23 = arith.constant dense<0.000000e+00> : vector<128x128xf32>
    %55 = tpu.matmul %54, %0, %cst_23 {dimension_numbers = #tpu.dot_dimension_numbers<[0], [0], [1], [1], [0, 1, 1, 1], [], []>} : vector<48x128xf32>, vector<48x128xf32>, vector<128x128xf32> -> vector<128x128xf32>
    %56 = arith.addf %55, %3 : vector<128x128xf32>
    %57 = arith.index_cast %52 : i32 to index
    %c0_24 = arith.constant 0 : index
    %58 = vector.load %arg4[%57, %c0_24] : memref<512x128xf32, #tpu.memory_space<vmem>>, vector<128x128xf32>
    tpu.vector_store %arg4[%57, %c0_24], %56 {strides = array<i32>} : memref<512x128xf32, #tpu.memory_space<vmem>>, vector<128x128xf32>,
    %cst_25 = arith.constant dense<0.000000e+00> : vector<128xf32>
    %59 = vector.multi_reduction <add>, %55, %cst_25 [0] : vector<128x128xf32> to vector<128xf32>
    %60 = vector.shape_cast %59 : vector<128xf32> to vector<1x128xf32>
    %61 = arith.addf %46, %60 : vector<1x128xf32>
    %62 = arith.mulf %55, %55 : vector<128x128xf32>
    %cst_26 = arith.constant dense<0.000000e+00> : vector<128xf32>
    %63 = vector.multi_reduction <add>, %62, %cst_26 [0] : vector<128x128xf32> to vector<128xf32>
    %64 = vector.shape_cast %63 : vector<128xf32> to vector<1x128xf32>
    %65 = arith.addf %50, %64 : vector<1x128xf32>
    %c4_i32 = arith.constant 4 : i32
    %cst_27 = arith.constant 0.000000e+00 : f32
    %66 = vector.broadcast %cst_27 : f32 to vector<6x128xf32>
    %67 = tpu.concatenate %61, %65, %66 in 0 : vector<1x128xf32>, vector<1x128xf32>, vector<6x128xf32> -> vector<8x128xf32>
    %c0_28 = arith.constant 0 : index
    %c0_29 = arith.constant 0 : index
    %c0_30 = arith.constant 0 : index
    %68 = vector.load %arg5[%c0_28, %c0_29, %c0_30] : memref<1x8x128xf32, #tpu.memory_space<vmem>>, vector<1x8x128xf32>
    %69 = vector.shape_cast %68 : vector<1x8x128xf32> to vector<8x128xf32>
    %70 = vector.shape_cast %67 : vector<8x128xf32> to vector<1x8x128xf32>
    tpu.vector_store %arg5[%c0_28, %c0_29, %c0_30], %70 {strides = array<i32>} : memref<1x8x128xf32, #tpu.memory_space<vmem>>, vector<1x8x128xf32>,
    return
  }
  func.func @transform_0(%arg0: i32) -> (i32, i32) {
    %c0_i32 = arith.constant 0 : i32
    %c0_i32_0 = arith.constant 0 : i32
    return %c0_i32, %arg0 : i32, i32
  }
  func.func @transform_1(%arg0: i32) -> (i32, i32) {
    %c0_i32 = arith.constant 0 : i32
    %c0_i32_0 = arith.constant 0 : i32
    %c0_i32_1 = arith.constant 0 : i32
    return %c0_i32, %c0_i32_0 : i32, i32
  }
  func.func @transform_2(%arg0: i32) -> (i32, i32) {
    %c0_i32 = arith.constant 0 : i32
    %c0_i32_0 = arith.constant 0 : i32
    %c0_i32_1 = arith.constant 0 : i32
    return %c0_i32, %c0_i32_0 : i32, i32
  }
  func.func @transform_3(%arg0: i32) -> (i32, i32) {
    %c0_i32 = arith.constant 0 : i32
    %c0_i32_0 = arith.constant 0 : i32
    return %arg0, %c0_i32 : i32, i32
  }
  func.func @transform_4(%arg0: i32) -> (i32, i32, i32) {
    %c0_i32 = arith.constant 0 : i32
    %c0_i32_0 = arith.constant 0 : i32
    %c0_i32_1 = arith.constant 0 : i32
    return %arg0, %c0_i32, %c0_i32_0 : i32, i32, i32
  }
}

</mosaic_0001>

<bundles_post_ra>
// kernel: tpu_custom_call.1
= control target key start
LH: loop header
LB: loop body
LE: loop exit
PB: predicated region body
PF: predicated region fallthrough
CT: control target
= control target key end

     0   :  { %10 = vsyncpa [#allocation3], 0  ;;  %s1466_s0 = inlined_call_operand.hbm [shape: f32[48,512], index: 0, kind: input, shape index: {}]   ;;  %s1467_s1 = inlined_call_operand.hbm [shape: f32[48,128], index: 1, kind: input, shape index: {}]   ;;  %s1468_s2 = inlined_call_operand.vmem [shape: f32[1,128], index: 2, kind: input, shape index: {}]   ;;  %s1469_s3 = inlined_call_operand.hbm [shape: f32[512,128], index: 3, kind: output, shape index: {0}]   ;;  %s1470_s4 = inlined_call_operand.hbm [shape: f32[1,8,128], index: 4, kind: output, shape index: {1}]  }
   0x1   :  { %11 = vsyncpa [#allocation6], 0 }
   0x2   :  { %12 = vsyncpa [#allocation4], 0 }
   0x3   :  { %13 = vsyncpa [#allocation9], 0  ;;  %s18_s17 = sshll.u32 %s1466_s0, 4  ;;  %s1258_s18 = smov [#allocation2]   ;;  %s19_s17 = int_to_ptr.hbm [resolvable:$true] %s18_s17 }
   0x4   :  { %s20_s19 = sshll.u32 %s1258_s18, 4  ;;  %s31_s22 = sshll.u32 %s1467_s1, 4  ;;  %s21_s19 = int_to_ptr.vmem [resolvable:$true] %s20_s19  ;;  %s32_s22 = int_to_ptr.hbm [resolvable:$true] %s31_s22 }
   0x5   :  { %s1259_s23 = smov 512   ;;  %s1260_s24 = smov 32  }
   0x6   :  { %26 = dma.hbm_to_vmem [thread:$0]  %s19_s17, 3072, %s21_s19, [#allocation3], %s1259_s23, %s1259_s23, %s1260_s24  }
   0x7   :  { %s1261_s25 = smov [#allocation5]   ;;  %s1262_s27 = smov 128  }
   0x8   :  { %s33_s26 = sshll.u32 %s1261_s25, 4  ;;  %s1263_s28 = smov 8   ;;  %s34_s26 = int_to_ptr.vmem [resolvable:$true] %s33_s26 }
   0x9   :  { %39 = dma.hbm_to_vmem [thread:$0]  %s32_s22, 768, %s34_s26, [#allocation6], %s1262_s27, %s1262_s27, %s1263_s28  }
   0xa   :  { %1250 = dma.done.wait [#allocation3], 3072  }
   0xb   :  { %1251 = vsyncadd [#allocation3], 4294964224 }
   0xc   :  { %1252 = dma.done.wait [#allocation6], 768  }
   0xd   :  { %1253 = vsyncadd [#allocation6], 4294966528  ;;  %v550_v0 = vld [vmem:[#allocation2 + $0x10] sm:$0xff]  ;;  %v795_v1 = vld [vmem:[#allocation2 + $0x18] sm:$0xff]  ;;  %vm98_vm0 = vcmask 392192   ;;  %s1050_s6 = sshll.u32 %s1469_s3, 4  ;;  %s1051_s6 = int_to_ptr.hbm [resolvable:$true] %s1050_s6 }
   0xe   :  { %556 = vxpose.xlu0.b32.start [1/6] (short) %v550_v0, 128  ;;  %801 = vxpose.xlu1.b32.start [1/6] (short) %v795_v1, 128  ;;  %v551_v2 = vld [vmem:[#allocation2 + $0x30] sm:$0xff]  ;;  %v796_v3 = vld [vmem:[#allocation2 + $0x38] sm:$0xff]  ;;  %v60_v4 = vld [vmem:[#allocation2] sm:$0xff]  ;;  %vm1039_vm1 = vcmask 1040384   ;;  %s1265_s3 = smov [#allocation8]   ;;  %s1064_s10 = sshll.u32 %s1470_s4, 4  ;;  %s1065_s10 = int_to_ptr.hbm [resolvable:$true] %s1064_s10 }
   0xf   :  { %66 = vxpose.xlu2.b32.start [1/6] (short) %v60_v4, 128  ;;  %v552_v5 = vld [vmem:[#allocation2 + $0x50] sm:$0xff]  ;;  %v797_v6 = vld [vmem:[#allocation2 + $0x58] sm:$0xff]  ;;  %v61_v7 = vld [vmem:[#allocation2 + $0x20] sm:$0xff]  ;;  %s1062_s7 = sshll.u32 %s1265_s3, 4  ;;  %vm1041_vm2 = vcmask 1041408   ;;  %s1063_s7 = int_to_ptr.vmem [resolvable:$true] %s1062_s7 }
  0x10   :  { %v553_v8 = vld [vmem:[#allocation2 + $0x70] sm:$0xff]  ;;  %v798_v9 = vld [vmem:[#allocation2 + $0x78] sm:$0xff]  ;;  %v62_v10 = vld [vmem:[#allocation2 + $0x40] sm:$0xff] }
  0x11   :  { %v554_v11 = vld [vmem:[#allocation2 + $0x90] sm:$0xff]  ;;  %v799_v12 = vld [vmem:[#allocation2 + $0x98] sm:$0xff]  ;;  %v63_v13 = vld [vmem:[#allocation2 + $0x60] sm:$0xff] }
  0x12   :  { %v555_v14 = vld [vmem:[#allocation2 + $0xb0] sm:$0xff]  ;;  %v800_v15 = vld [vmem:[#allocation2 + $0xb8] sm:$0xff]  ;;  %v64_v16 = vld [vmem:[#allocation2 + $0x80] sm:$0xff] }
  0x13   :  { %v65_v17 = vld [vmem:[#allocation2 + $0xa0] sm:$0xff]  ;;  %v55_v18 = vld [vmem:[#allocation5 + $0x28] sm:$0xff]  ;;  %v53_v20 = vld [vmem:[#allocation5 + $0x18] sm:$0xff] }
  0x14   :  { %v54_v19 = vld [vmem:[#allocation5 + $0x20] sm:$0xff]  ;;  %646 = vmatpush.msra.mxu2 %v55_v18  ;;  %891 = vmatpush.msra.mxu3 %v55_v18  ;;  %v305_v21 = vld [vmem:[#allocation2 + $0x8] sm:$0xff]  ;;  %v52_v22 = vld [vmem:[#allocation5 + $0x10] sm:$0xff] }
  0x15   :  { %157 = vmatpush.msra.mxu0 %v55_v18  ;;  %401 = vmatpush.msra.mxu1 %v55_v18  ;;  %v51_v23 = vld [vmem:[#allocation5 + $0x8] sm:$0xff]  ;;  %v50_v24 = vld [vmem:[#allocation5] sm:$0xff] }
  0x16   :  { %557 = vxpose.xlu0.b32.cont [2/6] (short) %v551_v2, 128  ;;  %802 = vxpose.xlu1.b32.cont [2/6] (short) %v796_v3, 128  ;;  %v306_v25 = vld [vmem:[#allocation2 + $0x28] sm:$0xff] }
  0x17   :  { %67 = vxpose.xlu2.b32.cont [2/6] (short) %v61_v7, 128  ;;  %647 = vmatpush.msra.mxu2 %v54_v19  ;;  %v307_v26 = vld [vmem:[#allocation2 + $0x48] sm:$0xff] }
  0x18   :  { %892 = vmatpush.msra.mxu3 %v54_v19  ;;  %158 = vmatpush.msra.mxu0 %v54_v19  ;;  %v308_v27 = vld [vmem:[#allocation2 + $0x68] sm:$0xff] }
  0x19   :  { %402 = vmatpush.msra.mxu1 %v54_v19  ;;  %648 = vmatpush.msra.mxu2 %v53_v20  ;;  %v309_v28 = vld [vmem:[#allocation2 + $0x88] sm:$0xff] }
  0x1a   :  { %893 = vmatpush.msra.mxu3 %v53_v20  ;;  %159 = vmatpush.msra.mxu0 %v53_v20  ;;  %v310_v31 = vld [vmem:[#allocation2 + $0xa8] sm:$0xff] }
  0x1b   :  { %403 = vmatpush.msra.mxu1 %v53_v20  ;;  %649 = vmatpush.msra.mxu2 %v52_v22 }
  0x1c   :  { %894 = vmatpush.msra.mxu3 %v52_v22  ;;  %160 = vmatpush.msra.mxu0 %v52_v22 }
  0x1d   :  { %650 = vmatpush.msra.mxu2 %v51_v23  ;;  %404 = vmatpush.msra.mxu1 %v52_v22 }
  0x1e   :  { %558 = vxpose.xlu0.b32.cont [3/6] (short) %v552_v5, 128  ;;  %803 = vxpose.xlu1.b32.cont [3/6] (short) %v797_v6, 128 }
  0x1f   :  { %68 = vxpose.xlu2.b32.cont [3/6] (short) %v62_v10, 128  ;;  %895 = vmatpush.msra.mxu3 %v51_v23 }
  0x20   :  { %161 = vmatpush.msra.mxu0 %v51_v23  ;;  %651 = vmatpush.msra.mxu2 %v50_v24 }
  0x21   :  { %405 = vmatpush.msra.mxu1 %v51_v23  ;;  %896 = vmatpush.msra.mxu3 %v50_v24 }
  0x22   :  { %162 = vmatpush.msra.mxu0 %v50_v24 }
  0x23   :  { %406 = vmatpush.msra.mxu1 %v50_v24 }
  0x26   :  { %559 = vxpose.xlu0.b32.cont [4/6] (short) %v553_v8, 128  ;;  %804 = vxpose.xlu1.b32.cont [4/6] (short) %v798_v9, 128 }
  0x27   :  { %69 = vxpose.xlu2.b32.cont [4/6] (short) %v63_v13, 128 }
  0x2e   :  { %560 = vxpose.xlu0.b32.cont [5/6] (short) %v554_v11, 128  ;;  %805 = vxpose.xlu1.b32.cont [5/6] (short) %v799_v12, 128 }
  0x2f   :  { %70 = vxpose.xlu2.b32.cont [5/6] (short) %v64_v16, 128 }
  0x36   :  { %561 = vxpose.xlu0.b32.end [6/6] (short) %v555_v14, 128  ;;  %806 = vxpose.xlu1.b32.end [6/6] (short) %v800_v15, 128  ;;  %v1351_v14 = vld [vmem:[%s1468_s2] ss:$0 sm:$0xff]  ;;  %s1264_s2 = smov [#allocation7]  }
  0x37   :  { %71 = vxpose.xlu2.b32.end [6/6] (short) %v65_v17, 128  ;;  %s1048_s29 = sshll.u32 %s1264_s2, 4  ;;  %s1049_s29 = int_to_ptr.vmem [resolvable:$true] %s1048_s29 }
  0x8e   :  { %311 = vxpose.xlu0.b32.start [1/6] (short) %v305_v21, 128 }
  0x96   :  { %312 = vxpose.xlu0.b32.cont [2/6] (short) %v306_v25, 128 }
  0x9e   :  { %313 = vxpose.xlu0.b32.cont [3/6] (short) %v307_v26, 128 }
  0xa6   :  { %314 = vxpose.xlu0.b32.cont [4/6] (short) %v308_v27, 128 }
  0xa8   :  { %v82_v29 = vpop.trf.xlu2 }
  0xa9   :  { %1080 = vmatmul.msk.f32.vlgmr.msra.gmra.mxu0 %vm98_vm0, %v82_v29 }
  0xae   :  { %315 = vxpose.xlu0.b32.cont [5/6] (short) %v309_v28, 128 }
  0xb0   :  { %v83_v33 = vpop.trf.xlu2 }
  0xb1   :  { %1081 = vmatmul.msk.f32.gmra.mxu0 %vm98_vm0, %v83_v33 }
  0xb2   :  { %v572_v30 = vpop.trf.xlu0  ;;  %v817_v32 = vpop.trf.xlu1 }
  0xb3   :  { %1112 = vmatmul.msk.f32.vlgmr.msra.gmra.mxu2 %vm98_vm0, %v572_v30  ;;  %1128 = vmatmul.msk.f32.vlgmr.msra.gmra.mxu3 %vm98_vm0, %v817_v32 }
  0xb6   :  { %316 = vxpose.xlu0.b32.end [6/6] (short) %v310_v31, 128 }
  0xb8   :  { %v84_v36 = vpop.trf.xlu2 }
  0xb9   :  { %1082 = vmatmul.msk.f32.gmra.mxu0 %vm98_vm0, %v84_v36 }
  0xba   :  { %v573_v34 = vpop.trf.xlu0  ;;  %v818_v35 = vpop.trf.xlu1 }
  0xbb   :  { %1113 = vmatmul.msk.f32.gmra.mxu2 %vm98_vm0, %v573_v34  ;;  %1129 = vmatmul.msk.f32.gmra.mxu3 %vm98_vm0, %v818_v35 }
  0xc0   :  { %v85_v39 = vpop.trf.xlu2 }
  0xc1   :  { %1083 = vmatmul.msk.f32.gmra.mxu0 %vm98_vm0, %v85_v39 }
  0xc2   :  { %v574_v37 = vpop.trf.xlu0  ;;  %v819_v38 = vpop.trf.xlu1 }
  0xc3   :  { %1114 = vmatmul.msk.f32.gmra.mxu2 %vm98_vm0, %v574_v37  ;;  %1130 = vmatmul.msk.f32.gmra.mxu3 %vm98_vm0, %v819_v38 }
  0xc8   :  { %v86_v42 = vpop.trf.xlu2 }
  0xc9   :  { %1084 = vmatmul.msk.f32.gmra.mxu0 %vm98_vm0, %v86_v42 }
  0xca   :  { %v575_v40 = vpop.trf.xlu0  ;;  %v820_v41 = vpop.trf.xlu1 }
  0xcb   :  { %1115 = vmatmul.msk.f32.gmra.mxu2 %vm98_vm0, %v575_v40  ;;  %1131 = vmatmul.msk.f32.gmra.mxu3 %vm98_vm0, %v820_v41 }
  0xd0   :  { %v87_v45 = vpop.trf.xlu2 }
  0xd1   :  { %1085 = vmatmul.msk.f32.gmra.mxu0 %vm98_vm0, %v87_v45 }
  0xd2   :  { %v576_v43 = vpop.trf.xlu0  ;;  %v821_v44 = vpop.trf.xlu1 }
  0xd3   :  { %1116 = vmatmul.msk.f32.gmra.mxu2 %vm98_vm0, %v576_v43  ;;  %1132 = vmatmul.msk.f32.gmra.mxu3 %vm98_vm0, %v821_v44 }
  0xd8   :  { %v88_v48 = vpop.trf.xlu2 }
  0xd9   :  { %1086 = vmatmul.msk.f32.gmra.mxu0 %vm98_vm0, %v88_v48 }
  0xda   :  { %v577_v46 = vpop.trf.xlu0  ;;  %v822_v47 = vpop.trf.xlu1 }
  0xdb   :  { %1117 = vmatmul.msk.f32.gmra.mxu2 %vm98_vm0, %v577_v46  ;;  %1133 = vmatmul.msk.f32.gmra.mxu3 %vm98_vm0, %v822_v47 }
  0xe0   :  { %v89_v51 = vpop.trf.xlu2 }
  0xe1   :  { %1087 = vmatmul.msk.f32.gmra.mxu0 %vm98_vm0, %v89_v51 }
  0xe2   :  { %v578_v49 = vpop.trf.xlu0  ;;  %v823_v50 = vpop.trf.xlu1 }
  0xe3   :  { %1118 = vmatmul.msk.f32.gmra.mxu2 %vm98_vm0, %v578_v49  ;;  %1134 = vmatmul.msk.f32.gmra.mxu3 %vm98_vm0, %v823_v50 }
  0xe8   :  { %v90_v54 = vpop.trf.xlu2 }
  0xe9   :  { %1088 = vmatmul.msk.f32.gmra.mxu0 %vm98_vm0, %v90_v54 }
  0xea   :  { %v579_v52 = vpop.trf.xlu0  ;;  %v824_v53 = vpop.trf.xlu1 }
  0xeb   :  { %1119 = vmatmul.msk.f32.gmra.mxu2 %vm98_vm0, %v579_v52  ;;  %1135 = vmatmul.msk.f32.gmra.mxu3 %vm98_vm0, %v824_v53 }
  0xf0   :  { %v91_v57 = vpop.trf.xlu2 }
  0xf1   :  { %1089 = vmatmul.msk.f32.gmra.mxu0 %vm98_vm0, %v91_v57 }
  0xf2   :  { %v580_v55 = vpop.trf.xlu0  ;;  %v825_v56 = vpop.trf.xlu1 }
  0xf3   :  { %1120 = vmatmul.msk.f32.gmra.mxu2 %vm98_vm0, %v580_v55  ;;  %1136 = vmatmul.msk.f32.gmra.mxu3 %vm98_vm0, %v825_v56 }
  0xf8   :  { %v92_v60 = vpop.trf.xlu2 }
  0xf9   :  { %1090 = vmatmul.msk.f32.gmra.mxu0 %vm98_vm0, %v92_v60 }
  0xfa   :  { %v581_v58 = vpop.trf.xlu0  ;;  %v826_v59 = vpop.trf.xlu1 }
  0xfb   :  { %1121 = vmatmul.msk.f32.gmra.mxu2 %vm98_vm0, %v581_v58  ;;  %1137 = vmatmul.msk.f32.gmra.mxu3 %vm98_vm0, %v826_v59 }
 0x100   :  { %v93_v63 = vpop.trf.xlu2 }
 0x101   :  { %1091 = vmatmul.msk.f32.gmra.mxu0 %vm98_vm0, %v93_v63 }
 0x102   :  { %v582_v61 = vpop.trf.xlu0  ;;  %v827_v62 = vpop.trf.xlu1 }
 0x103   :  { %1122 = vmatmul.msk.f32.gmra.mxu2 %vm98_vm0, %v582_v61  ;;  %1138 = vmatmul.msk.f32.gmra.mxu3 %vm98_vm0, %v827_v62 }
 0x108   :  { %v94_v2 = vpop.trf.xlu2 }
 0x109   :  { %1092 = vmatmul.msk.f32.gmra.mxu0 %vm98_vm0, %v94_v2 }
 0x10a   :  { %v583_v0 = vpop.trf.xlu0  ;;  %v828_v1 = vpop.trf.xlu1 }
 0x10b   :  { %1123 = vmatmul.msk.f32.gmra.mxu2 %vm98_vm0, %v583_v0  ;;  %1139 = vmatmul.msk.f32.gmra.mxu3 %vm98_vm0, %v828_v1 }
 0x110   :  { %v95_v5 = vpop.trf.xlu2 }
 0x111   :  { %1093 = vmatmul.msk.f32.gmra.mxu0 %vm98_vm0, %v95_v5 }
 0x112   :  { %v584_v3 = vpop.trf.xlu0  ;;  %v829_v4 = vpop.trf.xlu1 }
 0x113   :  { %1124 = vmatmul.msk.f32.gmra.mxu2 %vm98_vm0, %v584_v3  ;;  %1140 = vmatmul.msk.f32.gmra.mxu3 %vm98_vm0, %v829_v4 }
 0x118   :  { %v96_v8 = vpop.trf.xlu2 }
 0x119   :  { %1094 = vmatmul.msk.f32.gmra.mxu0 %vm98_vm0, %v96_v8 }
 0x11a   :  { %v585_v6 = vpop.trf.xlu0  ;;  %v830_v7 = vpop.trf.xlu1 }
 0x11b   :  { %1125 = vmatmul.msk.f32.gmra.mxu2 %vm98_vm0, %v585_v6  ;;  %1141 = vmatmul.msk.f32.gmra.mxu3 %vm98_vm0, %v830_v7 }
 0x120   :  { %v97_v11 = vpop.trf.xlu2 }
 0x121   :  { %1095 = vmatmul.msk.f32.gmra.mxu0 %vm98_vm0, %v97_v11 }
 0x122   :  { %v586_v9 = vpop.trf.xlu0  ;;  %v831_v10 = vpop.trf.xlu1 }
 0x123   :  { %1126 = vmatmul.msk.f32.gmra.mxu2 %vm98_vm0, %v586_v9  ;;  %1142 = vmatmul.msk.f32.gmra.mxu3 %vm98_vm0, %v831_v10 }
 0x126   :  { %v164_v15 = vpop.f32.mrf.mxu0 }
 0x127   :  { %v212_v16 = vadd.f32 %v1351_v14, %v164_v15  ;;  %v266_v19 = vmul.f32 %v164_v15, %v164_v15 }
 0x129   :  { %228 = vst [vmem:[#allocation7] sm:$0xff] %v212_v16 }
 0x12a   :  { %v587_v12 = vpop.trf.xlu0  ;;  %v832_v13 = vpop.trf.xlu1 }
 0x12b   :  { %1127 = vmatmul.msk.f32.gmra.mxu2 %vm98_vm0, %v587_v12  ;;  %1143 = vmatmul.msk.f32.gmra.mxu3 %vm98_vm0, %v832_v13 }
 0x12e   :  { %v167_v20 = vpop.f32.mrf.mxu0 }
 0x12f   :  { %v213_v23 = vadd.f32 %v1351_v14, %v167_v20  ;;  %v244_v24 = vadd.f32 %v167_v20, %v164_v15  ;;  %v267_v26 = vmul.f32 %v167_v20, %v167_v20 }
 0x131   :  { %v282_v28 = vadd.f32 %v267_v26, %v266_v19  ;;  %229 = vst [vmem:[#allocation7 + $0x8] sm:$0xff] %v213_v23 }
 0x132   :  { %v327_v17 = vpop.trf.xlu0 }
 0x133   :  { %1096 = vmatmul.msk.f32.vlgmr.msra.gmra.mxu1 %vm98_vm0, %v327_v17 }
 0x136   :  { %v653_v18 = vpop.f32.mrf.mxu2  ;;  %v898_v22 = vpop.f32.mrf.mxu3 }
 0x137   :  { %v701_v21 = vadd.f32 %v1351_v14, %v653_v18  ;;  %v946_v25 = vadd.f32 %v1351_v14, %v898_v22  ;;  %v756_v29 = vmul.f32 %v653_v18, %v653_v18  ;;  %v1001_v31 = vmul.f32 %v898_v22, %v898_v22  ;;  %v170_v32 = vpop.f32.mrf.mxu0 }
 0x138   :  { %v214_v37 = vadd.f32 %v1351_v14, %v170_v32  ;;  %v245_v41 = vadd.f32 %v244_v24, %v170_v32  ;;  %v268_v43 = vmul.f32 %v170_v32, %v170_v32 }
 0x139   :  { %718 = vst [vmem:[#allocation7 + $0x100] sm:$0xff] %v701_v21 }
 0x13a   :  { %v328_v27 = vpop.trf.xlu0  ;;  %963 = vst [vmem:[#allocation7 + $0x180] sm:$0xff] %v946_v25  ;;  %v283_v46 = vadd.f32 %v282_v28, %v268_v43 }
 0x13b   :  { %1097 = vmatmul.msk.f32.gmra.mxu1 %vm98_vm0, %v328_v27  ;;  %230 = vst [vmem:[#allocation7 + $0x10] sm:$0xff] %v214_v37 }
 0x13e   :  { %v656_v30 = vpop.f32.mrf.mxu2  ;;  %v901_v36 = vpop.f32.mrf.mxu3 }
 0x13f   :  { %v702_v33 = vadd.f32 %v1351_v14, %v656_v30  ;;  %v734_v34 = vadd.f32 %v656_v30, %v653_v18  ;;  %v757_v35 = vmul.f32 %v656_v30, %v656_v30  ;;  %v947_v38 = vadd.f32 %v1351_v14, %v901_v36  ;;  %v173_v48 = vpop.f32.mrf.mxu0 }
 0x140   :  { %v979_v39 = vadd.f32 %v901_v36, %v898_v22  ;;  %v1002_v40 = vmul.f32 %v901_v36, %v901_v36  ;;  %v215_v53 = vadd.f32 %v1351_v14, %v173_v48  ;;  %v246_v57 = vadd.f32 %v245_v41, %v173_v48 }
 0x141   :  { %719 = vst [vmem:[#allocation7 + $0x108] sm:$0xff] %v702_v33  ;;  %v772_v42 = vadd.f32 %v757_v35, %v756_v29  ;;  %v269_v59 = vmul.f32 %v173_v48, %v173_v48 }
 0x142   :  { %v329_v44 = vpop.trf.xlu0  ;;  %964 = vst [vmem:[#allocation7 + $0x188] sm:$0xff] %v947_v38  ;;  %v1017_v45 = vadd.f32 %v1002_v40, %v1001_v31 }
 0x143   :  { %1098 = vmatmul.msk.f32.gmra.mxu1 %vm98_vm0, %v329_v44  ;;  %231 = vst [vmem:[#allocation7 + $0x18] sm:$0xff] %v215_v53  ;;  %v284_v62 = vadd.f32 %v283_v46, %v269_v59 }
 0x146   :  { %v659_v47 = vpop.f32.mrf.mxu2  ;;  %v904_v52 = vpop.f32.mrf.mxu3 }
 0x147   :  { %v703_v49 = vadd.f32 %v1351_v14, %v659_v47  ;;  %v735_v50 = vadd.f32 %v734_v34, %v659_v47  ;;  %v758_v51 = vmul.f32 %v659_v47, %v659_v47  ;;  %v948_v54 = vadd.f32 %v1351_v14, %v904_v52  ;;  %v176_v0 = vpop.f32.mrf.mxu0 }
 0x148   :  { %v980_v55 = vadd.f32 %v979_v39, %v904_v52  ;;  %v1003_v56 = vmul.f32 %v904_v52, %v904_v52  ;;  %v216_v5 = vadd.f32 %v1351_v14, %v176_v0  ;;  %v247_v9 = vadd.f32 %v246_v57, %v176_v0 }
 0x149   :  { %720 = vst [vmem:[#allocation7 + $0x110] sm:$0xff] %v703_v49  ;;  %v773_v58 = vadd.f32 %v772_v42, %v758_v51  ;;  %v270_v11 = vmul.f32 %v176_v0, %v176_v0 }
 0x14a   :  { %v330_v60 = vpop.trf.xlu0  ;;  %965 = vst [vmem:[#allocation7 + $0x190] sm:$0xff] %v948_v54  ;;  %v1018_v61 = vadd.f32 %v1017_v45, %v1003_v56 }
 0x14b   :  { %1099 = vmatmul.msk.f32.gmra.mxu1 %vm98_vm0, %v330_v60  ;;  %232 = vst [vmem:[#allocation7 + $0x20] sm:$0xff] %v216_v5  ;;  %v285_v15 = vadd.f32 %v284_v62, %v270_v11 }
 0x14e   :  { %v662_v63 = vpop.f32.mrf.mxu2  ;;  %v907_v4 = vpop.f32.mrf.mxu3 }
 0x14f   :  { %v704_v1 = vadd.f32 %v1351_v14, %v662_v63  ;;  %v736_v2 = vadd.f32 %v735_v50, %v662_v63  ;;  %v759_v3 = vmul.f32 %v662_v63, %v662_v63  ;;  %v949_v6 = vadd.f32 %v1351_v14, %v907_v4  ;;  %v179_v17 = vpop.f32.mrf.mxu0 }
 0x150   :  { %v981_v7 = vadd.f32 %v980_v55, %v907_v4  ;;  %v1004_v8 = vmul.f32 %v907_v4, %v907_v4  ;;  %v217_v22 = vadd.f32 %v1351_v14, %v179_v17  ;;  %v248_v26 = vadd.f32 %v247_v9, %v179_v17 }
 0x151   :  { %721 = vst [vmem:[#allocation7 + $0x118] sm:$0xff] %v704_v1  ;;  %v774_v10 = vadd.f32 %v773_v58, %v759_v3  ;;  %v271_v28 = vmul.f32 %v179_v17, %v179_v17 }
 0x152   :  { %v331_v12 = vpop.trf.xlu0  ;;  %966 = vst [vmem:[#allocation7 + $0x198] sm:$0xff] %v949_v6  ;;  %v1019_v13 = vadd.f32 %v1018_v61, %v1004_v8 }
 0x153   :  { %1100 = vmatmul.msk.f32.gmra.mxu1 %vm98_vm0, %v331_v12  ;;  %233 = vst [vmem:[#allocation7 + $0x28] sm:$0xff] %v217_v22  ;;  %v286_v31 = vadd.f32 %v285_v15, %v271_v28 }
 0x156   :  { %v665_v16 = vpop.f32.mrf.mxu2  ;;  %v910_v21 = vpop.f32.mrf.mxu3 }
 0x157   :  { %v705_v18 = vadd.f32 %v1351_v14, %v665_v16  ;;  %v737_v19 = vadd.f32 %v736_v2, %v665_v16  ;;  %v760_v20 = vmul.f32 %v665_v16, %v665_v16  ;;  %v950_v23 = vadd.f32 %v1351_v14, %v910_v21  ;;  %v182_v33 = vpop.f32.mrf.mxu0 }
 0x158   :  { %v982_v24 = vadd.f32 %v981_v7, %v910_v21  ;;  %v1005_v25 = vmul.f32 %v910_v21, %v910_v21  ;;  %v218_v38 = vadd.f32 %v1351_v14, %v182_v33  ;;  %v249_v42 = vadd.f32 %v248_v26, %v182_v33 }
 0x159   :  { %722 = vst [vmem:[#allocation7 + $0x120] sm:$0xff] %v705_v18  ;;  %v775_v27 = vadd.f32 %v774_v10, %v760_v20  ;;  %v272_v44 = vmul.f32 %v182_v33, %v182_v33 }
 0x15a   :  { %v332_v29 = vpop.trf.xlu0  ;;  %967 = vst [vmem:[#allocation7 + $0x1a0] sm:$0xff] %v950_v23  ;;  %v1020_v30 = vadd.f32 %v1019_v13, %v1005_v25 }
 0x15b   :  { %1101 = vmatmul.msk.f32.gmra.mxu1 %vm98_vm0, %v332_v29  ;;  %234 = vst [vmem:[#allocation7 + $0x30] sm:$0xff] %v218_v38  ;;  %v287_v47 = vadd.f32 %v286_v31, %v272_v44 }
 0x15e   :  { %v668_v32 = vpop.f32.mrf.mxu2  ;;  %v913_v37 = vpop.f32.mrf.mxu3 }
 0x15f   :  { %v706_v34 = vadd.f32 %v1351_v14, %v668_v32  ;;  %v738_v35 = vadd.f32 %v737_v19, %v668_v32  ;;  %v761_v36 = vmul.f32 %v668_v32, %v668_v32  ;;  %v951_v39 = vadd.f32 %v1351_v14, %v913_v37  ;;  %v185_v49 = vpop.f32.mrf.mxu0 }
 0x160   :  { %v983_v40 = vadd.f32 %v982_v24, %v913_v37  ;;  %v1006_v41 = vmul.f32 %v913_v37, %v913_v37  ;;  %v219_v54 = vadd.f32 %v1351_v14, %v185_v49  ;;  %v250_v58 = vadd.f32 %v249_v42, %v185_v49 }
 0x161   :  { %723 = vst [vmem:[#allocation7 + $0x128] sm:$0xff] %v706_v34  ;;  %v776_v43 = vadd.f32 %v775_v27, %v761_v36  ;;  %v273_v60 = vmul.f32 %v185_v49, %v185_v49 }
 0x162   :  { %v333_v45 = vpop.trf.xlu0  ;;  %968 = vst [vmem:[#allocation7 + $0x1a8] sm:$0xff] %v951_v39  ;;  %v1021_v46 = vadd.f32 %v1020_v30, %v1006_v41 }
 0x163   :  { %1102 = vmatmul.msk.f32.gmra.mxu1 %vm98_vm0, %v333_v45  ;;  %235 = vst [vmem:[#allocation7 + $0x38] sm:$0xff] %v219_v54  ;;  %v288_v63 = vadd.f32 %v287_v47, %v273_v60 }
 0x166   :  { %v671_v48 = vpop.f32.mrf.mxu2  ;;  %v916_v53 = vpop.f32.mrf.mxu3 }
 0x167   :  { %v707_v50 = vadd.f32 %v1351_v14, %v671_v48  ;;  %v739_v51 = vadd.f32 %v738_v35, %v671_v48  ;;  %v762_v52 = vmul.f32 %v671_v48, %v671_v48  ;;  %v952_v55 = vadd.f32 %v1351_v14, %v916_v53  ;;  %v188_v1 = vpop.f32.mrf.mxu0 }
 0x168   :  { %v984_v56 = vadd.f32 %v983_v40, %v916_v53  ;;  %v1007_v57 = vmul.f32 %v916_v53, %v916_v53  ;;  %v220_v6 = vadd.f32 %v1351_v14, %v188_v1  ;;  %v251_v10 = vadd.f32 %v250_v58, %v188_v1 }
 0x169   :  { %724 = vst [vmem:[#allocation7 + $0x130] sm:$0xff] %v707_v50  ;;  %v777_v59 = vadd.f32 %v776_v43, %v762_v52  ;;  %v274_v12 = vmul.f32 %v188_v1, %v188_v1 }
 0x16a   :  { %v334_v61 = vpop.trf.xlu0  ;;  %969 = vst [vmem:[#allocation7 + $0x1b0] sm:$0xff] %v952_v55  ;;  %v1022_v62 = vadd.f32 %v1021_v46, %v1007_v57 }
 0x16b   :  { %1103 = vmatmul.msk.f32.gmra.mxu1 %vm98_vm0, %v334_v61  ;;  %236 = vst [vmem:[#allocation7 + $0x40] sm:$0xff] %v220_v6  ;;  %v289_v16 = vadd.f32 %v288_v63, %v274_v12 }
 0x16e   :  { %v674_v0 = vpop.f32.mrf.mxu2  ;;  %v919_v5 = vpop.f32.mrf.mxu3 }
 0x16f   :  { %v708_v2 = vadd.f32 %v1351_v14, %v674_v0  ;;  %v740_v3 = vadd.f32 %v739_v51, %v674_v0  ;;  %v763_v4 = vmul.f32 %v674_v0, %v674_v0  ;;  %v953_v7 = vadd.f32 %v1351_v14, %v919_v5  ;;  %v191_v18 = vpop.f32.mrf.mxu0 }
 0x170   :  { %v985_v8 = vadd.f32 %v984_v56, %v919_v5  ;;  %v1008_v9 = vmul.f32 %v919_v5, %v919_v5  ;;  %v221_v23 = vadd.f32 %v1351_v14, %v191_v18  ;;  %v252_v27 = vadd.f32 %v251_v10, %v191_v18 }
 0x171   :  { %725 = vst [vmem:[#allocation7 + $0x138] sm:$0xff] %v708_v2  ;;  %v778_v11 = vadd.f32 %v777_v59, %v763_v4  ;;  %v275_v29 = vmul.f32 %v191_v18, %v191_v18 }
 0x172   :  { %v335_v13 = vpop.trf.xlu0  ;;  %970 = vst [vmem:[#allocation7 + $0x1b8] sm:$0xff] %v953_v7  ;;  %v1023_v15 = vadd.f32 %v1022_v62, %v1008_v9 }
 0x173   :  { %1104 = vmatmul.msk.f32.gmra.mxu1 %vm98_vm0, %v335_v13  ;;  %237 = vst [vmem:[#allocation7 + $0x48] sm:$0xff] %v221_v23  ;;  %v290_v32 = vadd.f32 %v289_v16, %v275_v29 }
 0x176   :  { %v677_v17 = vpop.f32.mrf.mxu2  ;;  %v922_v22 = vpop.f32.mrf.mxu3 }
 0x177   :  { %v709_v19 = vadd.f32 %v1351_v14, %v677_v17  ;;  %v741_v20 = vadd.f32 %v740_v3, %v677_v17  ;;  %v764_v21 = vmul.f32 %v677_v17, %v677_v17  ;;  %v954_v24 = vadd.f32 %v1351_v14, %v922_v22  ;;  %v194_v34 = vpop.f32.mrf.mxu0 }
 0x178   :  { %v986_v25 = vadd.f32 %v985_v8, %v922_v22  ;;  %v1009_v26 = vmul.f32 %v922_v22, %v922_v22  ;;  %v222_v39 = vadd.f32 %v1351_v14, %v194_v34  ;;  %v253_v43 = vadd.f32 %v252_v27, %v194_v34 }
 0x179   :  { %726 = vst [vmem:[#allocation7 + $0x140] sm:$0xff] %v709_v19  ;;  %v779_v28 = vadd.f32 %v778_v11, %v764_v21  ;;  %v276_v45 = vmul.f32 %v194_v34, %v194_v34 }
 0x17a   :  { %v336_v30 = vpop.trf.xlu0  ;;  %971 = vst [vmem:[#allocation7 + $0x1c0] sm:$0xff] %v954_v24  ;;  %v1024_v31 = vadd.f32 %v1023_v15, %v1009_v26 }
 0x17b   :  { %1105 = vmatmul.msk.f32.gmra.mxu1 %vm98_vm0, %v336_v30  ;;  %238 = vst [vmem:[#allocation7 + $0x50] sm:$0xff] %v222_v39  ;;  %v291_v48 = vadd.f32 %v290_v32, %v276_v45 }
 0x17e   :  { %v680_v33 = vpop.f32.mrf.mxu2  ;;  %v925_v38 = vpop.f32.mrf.mxu3 }
 0x17f   :  { %v710_v35 = vadd.f32 %v1351_v14, %v680_v33  ;;  %v742_v36 = vadd.f32 %v741_v20, %v680_v33  ;;  %v765_v37 = vmul.f32 %v680_v33, %v680_v33  ;;  %v955_v40 = vadd.f32 %v1351_v14, %v925_v38  ;;  %v197_v50 = vpop.f32.mrf.mxu0 }
 0x180   :  { %v987_v41 = vadd.f32 %v986_v25, %v925_v38  ;;  %v1010_v42 = vmul.f32 %v925_v38, %v925_v38  ;;  %v223_v55 = vadd.f32 %v1351_v14, %v197_v50  ;;  %v254_v59 = vadd.f32 %v253_v43, %v197_v50 }
 0x181   :  { %727 = vst [vmem:[#allocation7 + $0x148] sm:$0xff] %v710_v35  ;;  %v780_v44 = vadd.f32 %v779_v28, %v765_v37  ;;  %v277_v61 = vmul.f32 %v197_v50, %v197_v50 }
 0x182   :  { %v337_v46 = vpop.trf.xlu0  ;;  %972 = vst [vmem:[#allocation7 + $0x1c8] sm:$0xff] %v955_v40  ;;  %v1025_v47 = vadd.f32 %v1024_v31, %v1010_v42 }
 0x183   :  { %1106 = vmatmul.msk.f32.gmra.mxu1 %vm98_vm0, %v337_v46  ;;  %239 = vst [vmem:[#allocation7 + $0x58] sm:$0xff] %v223_v55  ;;  %v292_v0 = vadd.f32 %v291_v48, %v277_v61 }
 0x186   :  { %v683_v49 = vpop.f32.mrf.mxu2  ;;  %v928_v54 = vpop.f32.mrf.mxu3 }
 0x187   :  { %v711_v51 = vadd.f32 %v1351_v14, %v683_v49  ;;  %v743_v52 = vadd.f32 %v742_v36, %v683_v49  ;;  %v766_v53 = vmul.f32 %v683_v49, %v683_v49  ;;  %v956_v56 = vadd.f32 %v1351_v14, %v928_v54  ;;  %v200_v2 = vpop.f32.mrf.mxu0 }
 0x188   :  { %v988_v57 = vadd.f32 %v987_v41, %v928_v54  ;;  %v1011_v58 = vmul.f32 %v928_v54, %v928_v54  ;;  %v224_v7 = vadd.f32 %v1351_v14, %v200_v2  ;;  %v255_v11 = vadd.f32 %v254_v59, %v200_v2 }
 0x189   :  { %728 = vst [vmem:[#allocation7 + $0x150] sm:$0xff] %v711_v51  ;;  %v781_v60 = vadd.f32 %v780_v44, %v766_v53  ;;  %v278_v13 = vmul.f32 %v200_v2, %v200_v2 }
 0x18a   :  { %v338_v62 = vpop.trf.xlu0  ;;  %973 = vst [vmem:[#allocation7 + $0x1d0] sm:$0xff] %v956_v56  ;;  %v1026_v63 = vadd.f32 %v1025_v47, %v1011_v58 }
 0x18b   :  { %1107 = vmatmul.msk.f32.gmra.mxu1 %vm98_vm0, %v338_v62  ;;  %240 = vst [vmem:[#allocation7 + $0x60] sm:$0xff] %v224_v7  ;;  %v293_v17 = vadd.f32 %v292_v0, %v278_v13 }
 0x18e   :  { %v686_v1 = vpop.f32.mrf.mxu2  ;;  %v931_v6 = vpop.f32.mrf.mxu3 }
 0x18f   :  { %v712_v3 = vadd.f32 %v1351_v14, %v686_v1  ;;  %v744_v4 = vadd.f32 %v743_v52, %v686_v1  ;;  %v767_v5 = vmul.f32 %v686_v1, %v686_v1  ;;  %v957_v8 = vadd.f32 %v1351_v14, %v931_v6  ;;  %v203_v19 = vpop.f32.mrf.mxu0 }
 0x190   :  { %v989_v9 = vadd.f32 %v988_v57, %v931_v6  ;;  %v1012_v10 = vmul.f32 %v931_v6, %v931_v6  ;;  %v225_v29 = vadd.f32 %v1351_v14, %v203_v19  ;;  %v256_v31 = vadd.f32 %v255_v11, %v203_v19 }
 0x191   :  { %729 = vst [vmem:[#allocation7 + $0x158] sm:$0xff] %v712_v3  ;;  %v782_v12 = vadd.f32 %v781_v60, %v767_v5  ;;  %v279_v32 = vmul.f32 %v203_v19, %v203_v19 }
 0x192   :  { %v339_v15 = vpop.trf.xlu0  ;;  %974 = vst [vmem:[#allocation7 + $0x1d8] sm:$0xff] %v957_v8  ;;  %v1027_v16 = vadd.f32 %v1026_v63, %v1012_v10 }
 0x193   :  { %1108 = vmatmul.msk.f32.gmra.mxu1 %vm98_vm0, %v339_v15  ;;  %241 = vst [vmem:[#allocation7 + $0x68] sm:$0xff] %v225_v29  ;;  %v294_v39 = vadd.f32 %v293_v17, %v279_v32 }
 0x196   :  { %v689_v18 = vpop.f32.mrf.mxu2  ;;  %v934_v23 = vpop.f32.mrf.mxu3 }
 0x197   :  { %v713_v20 = vadd.f32 %v1351_v14, %v689_v18  ;;  %v745_v21 = vadd.f32 %v744_v4, %v689_v18  ;;  %v768_v22 = vmul.f32 %v689_v18, %v689_v18  ;;  %v958_v26 = vadd.f32 %v1351_v14, %v934_v23  ;;  %v206_v33 = vpop.f32.mrf.mxu0 }
 0x198   :  { %v990_v27 = vadd.f32 %v989_v9, %v934_v23  ;;  %v1013_v28 = vmul.f32 %v934_v23, %v934_v23  ;;  %v226_v44 = vadd.f32 %v1351_v14, %v206_v33  ;;  %v257_v45 = vadd.f32 %v256_v31, %v206_v33 }
 0x199   :  { %730 = vst [vmem:[#allocation7 + $0x160] sm:$0xff] %v713_v20  ;;  %v783_v24 = vadd.f32 %v782_v12, %v768_v22  ;;  %v280_v46 = vmul.f32 %v206_v33, %v206_v33 }
 0x19a   :  { %v340_v25 = vpop.trf.xlu0  ;;  %975 = vst [vmem:[#allocation7 + $0x1e0] sm:$0xff] %v958_v26  ;;  %v1028_v37 = vadd.f32 %v1027_v16, %v1013_v28 }
 0x19b   :  { %1109 = vmatmul.msk.f32.gmra.mxu1 %vm98_vm0, %v340_v25  ;;  %242 = vst [vmem:[#allocation7 + $0x70] sm:$0xff] %v226_v44  ;;  %v295_v49 = vadd.f32 %v294_v39, %v280_v46 }
 0x19e   :  { %v692_v30 = vpop.f32.mrf.mxu2  ;;  %v937_v38 = vpop.f32.mrf.mxu3 }
 0x19f   :  { %v714_v34 = vadd.f32 %v1351_v14, %v692_v30  ;;  %v746_v35 = vadd.f32 %v745_v21, %v692_v30  ;;  %v769_v36 = vmul.f32 %v692_v30, %v692_v30  ;;  %v959_v40 = vadd.f32 %v1351_v14, %v937_v38  ;;  %v209_v51 = vpop.f32.mrf.mxu0 }
 0x1a0   :  { %v991_v41 = vadd.f32 %v990_v27, %v937_v38  ;;  %v1014_v42 = vmul.f32 %v937_v38, %v937_v38  ;;  %v227_v56 = vadd.f32 %v1351_v14, %v209_v51  ;;  %v1414_v60 = vadd.f32 %v257_v45, %v209_v51 }
 0x1a1   :  { %731 = vst [vmem:[#allocation7 + $0x168] sm:$0xff] %v714_v34  ;;  %v784_v43 = vadd.f32 %v783_v24, %v769_v36  ;;  %v281_v62 = vmul.f32 %v209_v51, %v209_v51 }
 0x1a2   :  { %v341_v47 = vpop.trf.xlu0  ;;  %976 = vst [vmem:[#allocation7 + $0x1e8] sm:$0xff] %v959_v40  ;;  %v1029_v48 = vadd.f32 %v1028_v37, %v1014_v42 }
 0x1a3   :  { %1110 = vmatmul.msk.f32.gmra.mxu1 %vm98_vm0, %v341_v47  ;;  %243 = vst [vmem:[#allocation7 + $0x78] sm:$0xff] %v227_v56  ;;  %v1417_v1 = vadd.f32 %v295_v49, %v281_v62 }
 0x1a6   :  { %v695_v50 = vpop.f32.mrf.mxu2  ;;  %v940_v55 = vpop.f32.mrf.mxu3 }
 0x1a7   :  { %v715_v52 = vadd.f32 %v1351_v14, %v695_v50  ;;  %v747_v53 = vadd.f32 %v746_v35, %v695_v50  ;;  %v770_v54 = vmul.f32 %v695_v50, %v695_v50  ;;  %v960_v57 = vadd.f32 %v1351_v14, %v940_v55 }
 0x1a8   :  { %v992_v58 = vadd.f32 %v991_v41, %v940_v55  ;;  %v1015_v59 = vmul.f32 %v940_v55, %v940_v55 }
 0x1a9   :  { %732 = vst [vmem:[#allocation7 + $0x170] sm:$0xff] %v715_v52  ;;  %v785_v61 = vadd.f32 %v784_v43, %v770_v54 }
 0x1aa   :  { %v342_v63 = vpop.trf.xlu0  ;;  %977 = vst [vmem:[#allocation7 + $0x1f0] sm:$0xff] %v960_v57  ;;  %v1030_v0 = vadd.f32 %v1029_v48, %v1015_v59 }
 0x1ab   :  { %1111 = vmatmul.msk.f32.gmra.mxu1 %vm98_vm0, %v342_v63 }
 0x1ae   :  { %v698_v2 = vpop.f32.mrf.mxu2  ;;  %v943_v6 = vpop.f32.mrf.mxu3 }
 0x1af   :  { %v716_v3 = vadd.f32 %v1351_v14, %v698_v2  ;;  %v1420_v4 = vadd.f32 %v747_v53, %v698_v2  ;;  %v771_v5 = vmul.f32 %v698_v2, %v698_v2  ;;  %v961_v8 = vadd.f32 %v1351_v14, %v943_v6 }
 0x1b0   :  { %v408_v7 = vpop.f32.mrf.mxu1  ;;  %v1423_v9 = vadd.f32 %v992_v58, %v943_v6  ;;  %v1016_v10 = vmul.f32 %v943_v6, %v943_v6 }
 0x1b1   :  { %733 = vst [vmem:[#allocation7 + $0x178] sm:$0xff] %v716_v3  ;;  %v1425_v11 = vadd.f32 %v785_v61, %v771_v5  ;;  %v456_v12 = vadd.f32 %v1351_v14, %v408_v7  ;;  %v511_v18 = vmul.f32 %v408_v7, %v408_v7 }
 0x1b2   :  { %978 = vst [vmem:[#allocation7 + $0x1f8] sm:$0xff] %v961_v8  ;;  %v1428_v13 = vadd.f32 %v1030_v0, %v1016_v10 }
 0x1b3   :  { %473 = vst [vmem:[#allocation7 + $0x80] sm:$0xff] %v456_v12 }
 0x1b8   :  { %v411_v15 = vpop.f32.mrf.mxu1 }
 0x1b9   :  { %v457_v16 = vadd.f32 %v1351_v14, %v411_v15  ;;  %v489_v17 = vadd.f32 %v411_v15, %v408_v7  ;;  %v512_v19 = vmul.f32 %v411_v15, %v411_v15  ;;  %v259_v15 = vrot.slane %v1414_v60, 4 }
 0x1bb   :  { %474 = vst [vmem:[#allocation7 + $0x88] sm:$0xff] %v457_v16  ;;  %v527_v20 = vadd.f32 %v512_v19, %v511_v18 }
 0x1c0   :  { %v414_v21 = vpop.f32.mrf.mxu1 }
 0x1c1   :  { %v458_v22 = vadd.f32 %v1351_v14, %v414_v21  ;;  %v490_v23 = vadd.f32 %v489_v17, %v414_v21  ;;  %v513_v24 = vmul.f32 %v414_v21, %v414_v21  ;;  %v297_v21 = vrot.slane %v1417_v1, 4 }
 0x1c3   :  { %475 = vst [vmem:[#allocation7 + $0x90] sm:$0xff] %v458_v22  ;;  %v528_v25 = vadd.f32 %v527_v20, %v513_v24  ;;  %v749_v22 = vrot.slane %v1420_v4, 4 }
 0x1c8   :  { %v417_v26 = vpop.f32.mrf.mxu1 }
 0x1c9   :  { %v459_v27 = vadd.f32 %v1351_v14, %v417_v26  ;;  %v491_v28 = vadd.f32 %v490_v23, %v417_v26  ;;  %v514_v29 = vmul.f32 %v417_v26, %v417_v26  ;;  %v787_v26 = vrot.slane %v1425_v11, 4 }
 0x1cb   :  { %476 = vst [vmem:[#allocation7 + $0x98] sm:$0xff] %v459_v27  ;;  %v529_v30 = vadd.f32 %v528_v25, %v514_v29  ;;  %v260_v27 = vadd.f32 %v259_v15, %v1414_v60  ;;  %v788_v60 = vadd.f32 %v787_v26, %v1425_v11 }
 0x1d0   :  { %v420_v31 = vpop.f32.mrf.mxu1 }
 0x1d1   :  { %v460_v32 = vadd.f32 %v1351_v14, %v420_v31  ;;  %v492_v33 = vadd.f32 %v491_v28, %v420_v31  ;;  %v515_v34 = vmul.f32 %v420_v31, %v420_v31  ;;  %v994_v28 = vrot.slane %v1423_v9, 4 }
 0x1d3   :  { %477 = vst [vmem:[#allocation7 + $0xa0] sm:$0xff] %v460_v32  ;;  %v530_v35 = vadd.f32 %v529_v30, %v515_v34  ;;  %v298_v32 = vadd.f32 %v297_v21, %v1417_v1  ;;  %v1032_v34 = vrot.slane %v1428_v13, 4 }
 0x1d8   :  { %v423_v36 = vpop.f32.mrf.mxu1 }
 0x1d9   :  { %v461_v37 = vadd.f32 %v1351_v14, %v423_v36  ;;  %v516_v52 = vmul.f32 %v423_v36, %v423_v36  ;;  %v493_v53 = vadd.f32 %v492_v33, %v423_v36  ;;  %v750_v33 = vadd.f32 %v749_v22, %v1420_v4 }
 0x1da   :  { %v1033_v4 = vadd.f32 %v1032_v34, %v1428_v13 }
 0x1db   :  { %478 = vst [vmem:[#allocation7 + $0xa8] sm:$0xff] %v461_v37  ;;  %v531_v55 = vadd.f32 %v530_v35, %v516_v52  ;;  %v261_v37 = vrot.slane %v260_v27, 2 }
 0x1e0   :  { %v426_v38 = vpop.f32.mrf.mxu1 }
 0x1e1   :  { %v462_v39 = vadd.f32 %v1351_v14, %v426_v38  ;;  %v517_v54 = vmul.f32 %v426_v38, %v426_v38  ;;  %v494_v56 = vadd.f32 %v493_v53, %v426_v38  ;;  %v995_v38 = vadd.f32 %v994_v28, %v1423_v9 }
 0x1e2   :  { %v789_v9 = vrot.slane %v788_v60, 2 }
 0x1e3   :  { %479 = vst [vmem:[#allocation7 + $0xb0] sm:$0xff] %v462_v39  ;;  %v532_v59 = vadd.f32 %v531_v55, %v517_v54  ;;  %v996_v11 = vrot.slane %v995_v38, 2 }
 0x1e4   :  { %v790_v55 = vadd.f32 %v789_v9, %v788_v60 }
 0x1e5   :  { %v997_v13 = vadd.f32 %v996_v11, %v995_v38 }
 0x1e8   :  { %v429_v40 = vpop.f32.mrf.mxu1 }
 0x1e9   :  { %v463_v41 = vadd.f32 %v1351_v14, %v429_v40  ;;  %v518_v57 = vmul.f32 %v429_v40, %v429_v40  ;;  %v495_v61 = vadd.f32 %v494_v56, %v429_v40 }
 0x1eb   :  { %480 = vst [vmem:[#allocation7 + $0xb8] sm:$0xff] %v463_v41  ;;  %v533_v0 = vadd.f32 %v532_v59, %v518_v57 }
 0x1f0   :  { %v432_v42 = vpop.f32.mrf.mxu1 }
 0x1f1   :  { %v464_v43 = vadd.f32 %v1351_v14, %v432_v42  ;;  %v519_v62 = vmul.f32 %v432_v42, %v432_v42  ;;  %v496_v2 = vadd.f32 %v495_v61, %v432_v42 }
 0x1f3   :  { %481 = vst [vmem:[#allocation7 + $0xc0] sm:$0xff] %v464_v43  ;;  %v534_v5 = vadd.f32 %v533_v0, %v519_v62  ;;  %v299_v43 = vrot.slane %v298_v32, 2 }
 0x1f8   :  { %v435_v44 = vpop.f32.mrf.mxu1 }
 0x1f9   :  { %v465_v45 = vadd.f32 %v1351_v14, %v435_v44  ;;  %v520_v3 = vmul.f32 %v435_v44, %v435_v44  ;;  %v497_v6 = vadd.f32 %v496_v2, %v435_v44  ;;  %v751_v44 = vrot.slane %v750_v33, 2 }
 0x1fa   :  { %v791_v2 = vrot.slane %v790_v55, 1 }
 0x1fb   :  { %482 = vst [vmem:[#allocation7 + $0xc8] sm:$0xff] %v465_v45  ;;  %v535_v8 = vadd.f32 %v534_v5, %v520_v3  ;;  %v998_v3 = vrot.slane %v997_v13, 1 }
 0x200   :  { %v438_v46 = vpop.f32.mrf.mxu1 }
 0x201   :  { %v466_v47 = vadd.f32 %v1351_v14, %v438_v46  ;;  %v521_v7 = vmul.f32 %v438_v46, %v438_v46  ;;  %v498_v10 = vadd.f32 %v497_v6, %v438_v46 }
 0x203   :  { %483 = vst [vmem:[#allocation7 + $0xd0] sm:$0xff] %v466_v47  ;;  %v536_v17 = vadd.f32 %v535_v8, %v521_v7  ;;  %v262_v47 = vadd.f32 %v261_v37, %v260_v27 }
 0x205   :  { %v263_v54 = vrot.slane %v262_v47, 1 }
 0x207   :  { %v264_v0 = vadd.f32 %v263_v54, %v262_v47 }
 0x208   :  { %v441_v48 = vpop.f32.mrf.mxu1 }
 0x209   :  { %v467_v49 = vadd.f32 %v1351_v14, %v441_v48  ;;  %v522_v12 = vmul.f32 %v441_v48, %v441_v48  ;;  %v499_v18 = vadd.f32 %v498_v10, %v441_v48 }
 0x20b   :  { %484 = vst [vmem:[#allocation7 + $0xd8] sm:$0xff] %v467_v49  ;;  %v537_v23 = vadd.f32 %v536_v17, %v522_v12  ;;  %v300_v49 = vadd.f32 %v299_v43, %v298_v32  ;;  %v999_v17 = vadd.f32 %v998_v3, %v997_v13 }
 0x210   :  { %v444_v50 = vpop.f32.mrf.mxu1 }
 0x211   :  { %v468_v51 = vadd.f32 %v1351_v14, %v444_v50  ;;  %v523_v19 = vmul.f32 %v444_v50, %v444_v50  ;;  %v500_v24 = vadd.f32 %v499_v18, %v444_v50  ;;  %v752_v50 = vadd.f32 %v751_v44, %v750_v33 }
 0x213   :  { %485 = vst [vmem:[#allocation7 + $0xe0] sm:$0xff] %v468_v51  ;;  %v538_v29 = vadd.f32 %v537_v23, %v523_v19  ;;  %v1034_v51 = vrot.slane %v1033_v4, 2  ;;  %v753_v59 = vrot.slane %v752_v50, 1 }
 0x215   :  { %v1035_v61 = vadd.f32 %v1034_v51, %v1033_v4  ;;  %v754_v8 = vadd.f32 %v753_v59, %v752_v50 }
 0x217   :  { %v1036_v10 = vrot.slane %v1035_v61, 1 }
 0x218   :  { %v447_v58 = vpop.f32.mrf.mxu1 }
 0x219   :  { %v469_v63 = vadd.f32 %v1351_v14, %v447_v58  ;;  %v524_v25 = vmul.f32 %v447_v58, %v447_v58  ;;  %v501_v30 = vadd.f32 %v500_v24, %v447_v58  ;;  %v301_v58 = vrot.slane %v300_v49, 1 }
 0x21b   :  { %486 = vst [vmem:[#allocation7 + $0xe8] sm:$0xff] %v469_v63  ;;  %v539_v35 = vadd.f32 %v538_v29, %v524_v25  ;;  %v302_v7 = vadd.f32 %v301_v58, %v300_v49 }
 0x220   :  { %v450_v16 = vpop.f32.mrf.mxu1 }
 0x221   :  { %v470_v20 = vadd.f32 %v1351_v14, %v450_v16  ;;  %v525_v31 = vmul.f32 %v450_v16, %v450_v16  ;;  %v502_v36 = vadd.f32 %v501_v30, %v450_v16  ;;  %v792_v16 = vadd.f32 %v791_v2, %v790_v55 }
 0x223   :  { %487 = vst [vmem:[#allocation7 + $0xf0] sm:$0xff] %v470_v20  ;;  %v540_v40 = vadd.f32 %v539_v35, %v525_v31  ;;  %v1037_v20 = vadd.f32 %v1036_v10, %v1035_v61 }
 0x228   :  { %v453_v39 = vpop.f32.mrf.mxu1 }
 0x229   :  { %v471_v1 = vadd.f32 %v1351_v14, %v453_v39  ;;  %v503_v41 = vadd.f32 %v502_v36, %v453_v39  ;;  %v526_v42 = vmul.f32 %v453_v39, %v453_v39 }
 0x22b   :  { %488 = vst [vmem:[#allocation7 + $0xf8] sm:$0xff] %v471_v1  ;;  %v504_v45 = vrot.slane %v503_v41, 4  ;;  %v541_v46 = vadd.f32 %v540_v40, %v526_v42 }
 0x22c   :  { %1056 = dma.vmem_to_hbm [thread:$0]  %s1049_s29, 8192, %s1051_s6, [#allocation4], %s1262_s27, %s1262_s27, %s1263_s28  }
 0x22d   :  { %v505_v48 = vadd.f32 %v504_v45, %v503_v41  ;;  %v542_v14 = vrot.slane %v541_v46, 4 }
 0x22f   :  { %v506_v52 = vrot.slane %v505_v48, 2  ;;  %v543_v53 = vadd.f32 %v542_v14, %v541_v46 }
 0x231   :  { %v507_v56 = vadd.f32 %v506_v52, %v505_v48  ;;  %v544_v57 = vrot.slane %v543_v53, 2 }
 0x233   :  { %v508_v62 = vrot.slane %v507_v56, 1  ;;  %v545_v63 = vadd.f32 %v544_v57, %v543_v53 }
 0x235   :  { %v509_v5 = vadd.f32 %v508_v62, %v507_v56  ;;  %v546_v6 = vrot.slane %v545_v63, 1 }
 0x237   :  { %v510_v12 = vadd.f32 %v509_v5, %v264_v0  ;;  %v547_v15 = vadd.f32 %v546_v6, %v545_v63 }
 0x239   :  { %v548_v18 = vadd.f32 %v547_v15, %v302_v7  ;;  %v755_v19 = vadd.f32 %v754_v8, %v510_v12 }
 0x23b   :  { %v793_v21 = vadd.f32 %v792_v16, %v548_v18  ;;  %v1000_v22 = vadd.f32 %v999_v17, %v755_v19 }
 0x23d   :  { %v1038_v23 = vadd.f32 %v1037_v20, %v793_v21 }
 0x23f   :  { %v1040_v24 = vsel %vm1039_vm1, %v1000_v22, %v1038_v23 }
 0x240   :  { %v1042_v25 = vsel %vm1041_vm2, %v1040_v24, 0.0 }
 0x241   :  { %1043 = vst [vmem:[#allocation8] sm:$0xff] %v1042_v25 }
 0x242   :  { %1067 = dma.vmem_to_hbm [thread:$0]  %s1063_s7, 128, %s1065_s10, [#allocation9]  }
 0x243   :  { %1254 = dma.done.wait [#allocation4], 8192  }
 0x244   :  { %1255 = vsyncadd [#allocation4], 4294959104 }
 0x245   :  { %1256 = dma.done.wait [#allocation9], 128  }
 0x246   :  { %1257 = vsyncadd [#allocation9], 4294967168 }
 0x247   :  { %1076 = vsyncpa [#allocation3], 1 }
 0x248   :  { %1077 = vsyncpa [#allocation6], 1 }
 0x249   :  { %1078 = vsyncpa [#allocation4], 1 }
 0x24a   :  { %1079 = vsyncpa [#allocation9], 1 }

</bundles_post_ra>
